<compile_context>
chip_gen: v7x
topology: tpu7x:2x2x1
jax: 0.10.0
libtpu: 0.0.40
codegen_flags: <defaults>
</compile_context>

<pallas_src>
import functools

import jax
import jax.numpy as jnp
from jax.experimental import pallas as pl
from jax.experimental.pallas import tpu as pltpu

_BF16 = jnp.bfloat16
# Explicit scoped-VMEM budget (safe on v5e/v6e/v7x); working sets here are tiny.
_PARAMS = pltpu.CompilerParams(vmem_limit_bytes=32 * 1024 * 1024)


# ----------------------------------------------------------------------------
# small helpers (traced inside kernels)
# ----------------------------------------------------------------------------
def _dot_t(x, w):
    # x:[M,K] @ w:[N,K]^T -> [M,N] f32   (bf16 operands, f32 MXU accumulation)
    return jax.lax.dot_general(
        x, w, dimension_numbers=(((1,), (1,)), ((), ())),
        preferred_element_type=jnp.float32)


def _gru_cell(gi, h, whh, bhh):
    """PyTorch nn.GRUCell gate math.  gi = W_ih@[x(,ctx)] + b_ih (precomputed,
    f32); h is the f32 hidden state; whh bf16 [3H,H]; bhh f32 [1,3H].
    Gate slices land on 128-lane boundaries because H is a multiple of 128."""
    H = whh.shape[1]
    gh = _dot_t(h.astype(_BF16), whh) + bhh
    i_r, i_z, i_n = gi[:, :H], gi[:, H:2 * H], gi[:, 2 * H:]
    h_r, h_z, h_n = gh[:, :H], gh[:, H:2 * H], gh[:, 2 * H:]
    r = jax.nn.sigmoid(i_r + h_r)
    z = jax.nn.sigmoid(i_z + h_z)
    n = jnp.tanh(i_n + r * h_n)
    return (1.0 - z) * n + z * h


def _attend(h, enc, wq):
    """Dot attention over enc [B,T,H] (bf16) with query h @ Wq^T.  Exact
    softmax (no approx reciprocal) so alpha sums to 1 like the reference."""
    q = _dot_t(h.astype(_BF16), wq)                          # [B,H] f32
    # TODO(synk): at production T (~40-80) route these two contractions through
    # the MXU as batched einsums ('bth,bh->bt' / 'bt,bth->bh'); negligible here.
    scores = jnp.sum(enc * q[:, None, :], axis=-1)           # [B,T] f32
    m = jnp.max(scores, axis=-1, keepdims=True)
    e = jnp.exp(scores - m)
    alpha = e / jnp.sum(e, axis=-1, keepdims=True)
    return jnp.sum(alpha[:, :, None] * enc, axis=1)          # [B,H] f32


# ----------------------------------------------------------------------------
# Pallas kernels (all gridless: whole operands VMEM-resident, loop inside)
# ----------------------------------------------------------------------------
def _linear_kernel(x_ref, w_ref, b_ref, o_ref):
    o_ref[...] = _dot_t(x_ref[...], w_ref[...]) + b_ref[...]


def linear(x, w, b):
    """One-shot full-array linear: x @ w^T + b (bf16 MXU operands, f32 out)."""
    M = x.shape[0]
    N = w.shape[0]
    return pl.pallas_call(
        _linear_kernel,
        out_shape=jax.ShapeDtypeStruct((M, N), jnp.float32),
        compiler_params=_PARAMS,
    )(x.astype(_BF16), w.astype(_BF16), b.astype(jnp.float32))


def _proj_logsoftmax_kernel(h_ref, w_ref, b_ref, o_ref):
    # TODO(synk): for production vocab, tile the row (M) axis with a grid and,
    # on v7x (64 MiB VMEM), stream W_out from HBM in V-tiles with an online LSE.
    logits = _dot_t(h_ref[...], w_ref[...]) + b_ref[...]
    s = logits - jnp.max(logits, axis=-1, keepdims=True)
    o_ref[...] = s - jnp.log(jnp.sum(jnp.exp(s), axis=-1, keepdims=True))


def proj_logsoftmax(h, w, b):
    """Batched vocab projection + log-softmax: [M,H] x [V,H]^T -> [M,V]."""
    M = h.shape[0]
    V = w.shape[0]
    return pl.pallas_call(
        _proj_logsoftmax_kernel,
        out_shape=jax.ShapeDtypeStruct((M, V), jnp.float32),
        compiler_params=_PARAMS,
    )(h.astype(_BF16), w.astype(_BF16), b.astype(jnp.float32))


def _gru_scan_kernel(gi_ref, whh_ref, bhh_ref, out_ref):
    """Fused GRU time scan; the input-to-hidden matmul (gi) is precomputed."""
    steps = gi_ref.shape[0]

    def step(t, h):
        h_new = _gru_cell(gi_ref[t], h, whh_ref[...], bhh_ref[...])
        out_ref[t] = h_new
        return h_new

    h0 = jnp.zeros(out_ref.shape[1:], jnp.float32)
    _ = jax.lax.fori_loop(0, steps, step, h0, unroll=True)


def run_gru(x_seq, gp):
    """GRU over time.  x_seq: [B,T,Din] -> time-major hidden states [T,B,H]."""
    B, T, Din = x_seq.shape
    H = gp['w_hh'].shape[1]
    # Hoisted input-to-hidden matmul, done time-major (transpose the narrow x,
    # not the 3H-wide gi) so the scan's stores are dense and need no transpose.
    x_tm = x_seq.transpose(1, 0, 2).reshape(T * B, Din)
    gi = linear(x_tm, gp['w_ih'], gp['b_ih']).reshape(T, B, 3 * H)
    return pl.pallas_call(
        _gru_scan_kernel,
        out_shape=jax.ShapeDtypeStruct((T, B, H), jnp.float32),
        compiler_params=_PARAMS,
    )(gi, gp['w_hh'].astype(_BF16), gp['b_hh'])


def _decode_tf_kernel(gix_ref, enc_ref, h0_ref, wq_ref, wihc_ref, whh_ref,
                      bhh_ref, hs_ref, hfin_ref):
    """Teacher-forced attention-GRU scan.  Emits hidden states only; the vocab
    projection + log-softmax is hoisted into one batched MXU pass afterwards."""
    steps = gix_ref.shape[0]

    def step(t, h):
        ctx = _attend(h, enc_ref[...], wq_ref[...])
        gi = gix_ref[t] + _dot_t(ctx.astype(_BF16), wihc_ref[...])
        h_new = _gru_cell(gi, h, whh_ref[...], bhh_ref[...])
        hs_ref[t] = h_new
        return h_new

    h_fin = jax.lax.fori_loop(0, steps, step, h0_ref[...], unroll=True)
    hfin_ref[...] = h_fin        # written once, after the loop


def _decode_greedy_kernel(emb_ref, enc_ref, h0_ref, wq_ref, wihx_ref, wihc_ref,
                          whh_ref, bih_ref, bhh_ref, wout_ref, bout_ref,
                          lp_ref, hfin_ref, *, sos_id):
    """Greedy (inference) decode: next token = argmax of this step's log-probs.
    The per-step vocab projection cannot be hoisted (argmax feedback); the
    embedding lookup is a one-hot @ E matmul on the VMEM-resident bf16 table.
    TODO(synk): for production vocab on v7x, keep E/Wout in HBM, tile the V
    axis of the projection and gather embedding rows with make_async_copy."""
    steps, B, V = lp_ref.shape
    lane_v = jax.lax.broadcasted_iota(jnp.int32, (B, V), 1)
    oh0 = (lane_v == sos_id).astype(_BF16)                   # <sos> one-hot

    def step(t, carry):
        h, oh = carry
        x = jnp.dot(oh, emb_ref[...], preferred_element_type=jnp.float32)
        ctx = _attend(h, enc_ref[...], wq_ref[...])
        gi = (_dot_t(x.astype(_BF16), wihx_ref[...])
              + _dot_t(ctx.astype(_BF16), wihc_ref[...]) + bih_ref[...])
        h_new = _gru_cell(gi, h, whh_ref[...], bhh_ref[...])
        logits = _dot_t(h_new.astype(_BF16), wout_ref[...]) + bout_ref[...]
        s = logits - jnp.max(logits, axis=-1, keepdims=True)
        lp = s - jnp.log(jnp.sum(jnp.exp(s), axis=-1, keepdims=True))
        lp_ref[t] = lp
        # greedy next-token one-hot (argmax, first occurrence on ties)
        mx = jnp.max(lp, axis=-1, keepdims=True)
        idx = jnp.min(jnp.where(lp == mx, lane_v, V), axis=-1, keepdims=True)
        return h_new, (lane_v == idx).astype(_BF16)

    h_fin, _ = jax.lax.fori_loop(0, steps, step, (h0_ref[...], oh0),
                                 unroll=True)
    hfin_ref[...] = h_fin        # written once, after the loop


# ----------------------------------------------------------------------------
# decoder wrappers
# ----------------------------------------------------------------------------
def _dec_weights(dp):
    g = dp['gru']
    H = g['w_hh'].shape[1]
    return {'Wq': dp['Wq'].astype(_BF16),
            'w_ih_x': g['w_ih'][:, :H],                   # x half (hoisted)
            'w_ih_c': g['w_ih'][:, H:].astype(_BF16),     # ctx half (in-scan)
            'w_hh': g['w_hh'].astype(_BF16)}


def decode_teacher_forced(dp, enc, h0, target):
    """Returns (log_probs [B, L-1, V] batch-major, final hidden [B, H])."""
    B, _, H = enc.shape
    S = target.shape[1] - 1
    V = dp['Wout'].shape[0]
    g = dp['gru']
    w = _dec_weights(dp)
    # Hoisted x-half of the GRU input matmul (incl. b_ih), time-major.
    x_tm = dp['E'][target[:, :S]].transpose(1, 0, 2).reshape(S * B, H)
    gi_x = linear(x_tm, w['w_ih_x'], g['b_ih']).reshape(S, B, 3 * H)
    hs, hfin = pl.pallas_call(
        _decode_tf_kernel,
        out_shape=(jax.ShapeDtypeStruct((S, B, H), jnp.float32),
                   jax.ShapeDtypeStruct((B, H), jnp.float32)),
        compiler_params=_PARAMS,
    )(gi_x, enc.astype(_BF16), h0, w['Wq'], w['w_ih_c'], w['w_hh'], g['b_hh'])
    # Hoisted vocab projection + log-softmax: one big batched MXU pass.
    # Transpose the narrow [S,B,H] hidden states (not the wide [B,S,V] output).
    hs_bm = hs.transpose(1, 0, 2).reshape(B * S, H)
    lp = proj_logsoftmax(hs_bm, dp['Wout'], dp['bout']).reshape(B, S, V)
    return lp, hfin


def decode_greedy(dp, enc, h0, max_len):
    """Returns (log_probs [L-1, B, V] TIME-major, final hidden [B, H])."""
    B, _, H = enc.shape
    V = dp['Wout'].shape[0]
    S = max_len - 1
    g = dp['gru']
    w = _dec_weights(dp)
    lp_tm, hfin = pl.pallas_call(
        functools.partial(_decode_greedy_kernel, sos_id=dp.get('sos_id', 0)),
        out_shape=(jax.ShapeDtypeStruct((S, B, V), jnp.float32),
                   jax.ShapeDtypeStruct((B, H), jnp.float32)),
        compiler_params=_PARAMS,
    )(dp['E'].astype(_BF16), enc.astype(_BF16), h0, w['Wq'],
      w['w_ih_x'].astype(_BF16), w['w_ih_c'], w['w_hh'],
      g['b_ih'], g['b_hh'], dp['Wout'].astype(_BF16), dp['bout'])
    return lp_tm, hfin


# ----------------------------------------------------------------------------
# Model components (Python glue around the fused kernels)
# ----------------------------------------------------------------------------
def encoder_forward(p, vid_feats, labels_character, labels_random_character,
                    labels_character_template, target_variable,
                    target_variable_template):
    B, Tv, Dv = vid_feats.shape
    H = p['H']
    # video branch: linear projection + fused GRU scan
    x = linear(vid_feats.reshape(B * Tv, Dv), p['W_v2h'],
               p['b_v2h']).reshape(B, Tv, H)
    video_outputs = run_gru(x, p['enc_vid_gru']).transpose(1, 0, 2)   # [B,Tv,H]

    # sentence branches share weights -> one 2B-batched scan
    sent_tok = jnp.concatenate([target_variable, target_variable_template], 0)
    sent_out = run_gru(p['E_word'][sent_tok],
                       p['enc_sent_gru']).transpose(1, 0, 2)          # [2B,L,H]
    sentence_outputs, template_sentence_outputs = jnp.split(sent_out, 2, axis=0)

    # syntax (character) branches share weights -> one 2B-batched scan;
    # only the final step is used, and it is read time-major (no transpose).
    char_tok = jnp.concatenate([labels_character, labels_character_template], 0)
    char_last = run_gru(p['E_char'][char_tok], p['enc_syn_gru'])[-1]  # [2B,H]
    syn_last, tmpl_syn_last = jnp.split(char_last, 2, axis=0)
    syntax_encoder_outputs = syn_last[:, None, :]                     # [B,1,H]
    template_syntax_encoder_outputs = tmpl_syn_last[:, None, :]       # [B,1,H]
    # TODO(synk): labels_random_character feeds a contrastive branch inside the
    # original (opaque) encoder that does not affect the returned tensors.
    return (video_outputs, sentence_outputs, template_sentence_outputs,
            syntax_encoder_outputs, template_syntax_encoder_outputs)


def decoder_forward(dp, enc_outputs, syntax_enc, target, mode):
    """Attention caption decoder. Returns (seq_prob, seq_preds, syntax_vec)."""
    B, _, H = enc_outputs.shape
    h0 = (syntax_enc[:, 0, :] if syntax_enc is not None
          else jnp.zeros((B, H), jnp.float32))
    if mode == 'train' and target is not None:
        seq_prob, hfin = decode_teacher_forced(dp, enc_outputs, h0, target)
        seq_preds = []
    else:
        max_len = target.shape[1] if target is not None else dp['max_len']
        lp_tm, hfin = decode_greedy(dp, enc_outputs, h0, max_len)
        seq_prob = lp_tm.transpose(1, 0, 2)
        seq_preds = jnp.argmax(seq_prob, axis=-1).astype(jnp.int32)
    return seq_prob, seq_preds, hfin[None, :, :]                      # [1,B,H]


def syntax_decoder_forward(dp, enc_outputs, encoder_hidden, target, mode):
    """Syntax (parse) decoder over a [B,1,H] syntax vector."""
    del encoder_hidden  # always None in S2VTAttModel.forward
    B, _, H = enc_outputs.shape
    h0 = jnp.zeros((B, H), jnp.float32)
    if mode == 'train':
        seq_prob, _ = decode_teacher_forced(dp, enc_outputs, h0, target)
        return seq_prob, []
    lp_tm, _ = decode_greedy(dp, enc_outputs, h0, target.shape[1])
    seq_prob = lp_tm.transpose(1, 0, 2)
    return seq_prob, jnp.argmax(seq_prob, axis=-1).astype(jnp.int32)


def s2vt_att_forward(p, vid_feats, target_variable, target_variable_template,
                     labels_character, labels_random_character,
                     labels_character_template, target_variable_parse,
                     target_variable_parse_template, mode='train', opt=None):
    """Mirrors S2VTAttModel.forward."""
    (video_outputs, sentence_outputs, template_sentence_outputs,
     syntax_encoder_outputs, template_syntax_encoder_outputs) = encoder_forward(
        p, vid_feats, labels_character, labels_random_character,
        labels_character_template, target_variable, target_variable_template)

    # (self.vid2hid is initialized in __init__ but never used in forward;
    #  kept in params for parity, deliberately unused here.)
    dp, dps = p['dec'], p['dec_syn']
    B, _, H = video_outputs.shape

    if mode != 'train':
        seq_prob, seq_preds, _ = decoder_forward(
            dp, video_outputs, syntax_encoder_outputs, target_variable, mode)
        return seq_prob, seq_preds

    h_syn = syntax_encoder_outputs[:, 0, :]
    h_syn_t = template_syntax_encoder_outputs[:, 0, :]

    # ---- three weight-sharing teacher-forced caption decodes: batch to 3B ----
    if (video_outputs.shape[1] == sentence_outputs.shape[1]
            and target_variable.shape[1] == target_variable_template.shape[1]):
        enc3 = jnp.concatenate(
            [video_outputs, sentence_outputs, template_sentence_outputs], 0)
        h03 = jnp.concatenate([h_syn, h_syn, h_syn_t], 0)
        tgt3 = jnp.concatenate(
            [target_variable, target_variable, target_variable_template], 0)
        lp3, hf3 = decode_teacher_forced(dp, enc3, h03, tgt3)
        seq_prob, seq_prob_sen, seq_prob_sen_template = jnp.split(lp3, 3, 0)
        origin_syntax_vec, origin_syntax_vec1, template_syntax_vec1 = (
            jnp.split(hf3, 3, 0))
    else:  # fallback when sequence lengths differ
        seq_prob, origin_syntax_vec = decode_teacher_forced(
            dp, video_outputs, h_syn, target_variable)
        seq_prob_sen, origin_syntax_vec1 = decode_teacher_forced(
            dp, sentence_outputs, h_syn, target_variable)
        seq_prob_sen_template, template_syntax_vec1 = decode_teacher_forced(
            dp, template_sentence_outputs, h_syn_t, target_variable_template)

    # ---- 4th caption decode (inference mode, only the final h is used) ----
    # TODO(synk): on v7x, run this greedy decode on the second TensorCore
    # concurrently with the 3B teacher-forced decode (pl.core_map).
    _, template_syntax_vec = decode_greedy(dp, video_outputs, h_syn_t,
                                           dp['max_len'])

    # ---- four weight-sharing syntax decodes: batch to 4B ----
    if (target_variable_parse.shape[1]
            == target_variable_parse_template.shape[1]):
        enc4 = jnp.concatenate(
            [origin_syntax_vec, origin_syntax_vec1,
             template_syntax_vec, template_syntax_vec1], 0)[:, None, :]
        tgt4 = jnp.concatenate(
            [target_variable_parse, target_variable_parse,
             target_variable_parse_template, target_variable_parse_template], 0)
        h04 = jnp.zeros((4 * B, H), jnp.float32)
        lp4, _ = decode_teacher_forced(dps, enc4, h04, tgt4)
        (seq_prob_syntax, seq_prob_syntax1, seq_prob_syntax_template,
         seq_prob_syntax_template1) = jnp.split(lp4, 4, 0)
    else:  # fallback when parse lengths differ
        seq_prob_syntax, _ = syntax_decoder_forward(
            dps, origin_syntax_vec[:, None, :], None, target_variable_parse,
            mode)
        seq_prob_syntax1, _ = syntax_decoder_forward(
            dps, origin_syntax_vec1[:, None, :], None, target_variable_parse,
            mode)
        seq_prob_syntax_template, _ = syntax_decoder_forward(
            dps, template_syntax_vec[:, None, :], None,
            target_variable_parse_template, mode)
        seq_prob_syntax_template1, _ = syntax_decoder_forward(
            dps, template_syntax_vec1[:, None, :], None,
            target_variable_parse_template, mode)

    return (seq_prob, seq_prob_sen, seq_prob_sen_template, seq_prob_syntax,
            seq_prob_syntax1, seq_prob_syntax_template,
            seq_prob_syntax_template1)


# ----------------------------------------------------------------------------
# Deterministic parameter init
# ----------------------------------------------------------------------------
def init_params(key, dim_vid, H, vocab, char_vocab, parse_vocab, max_len):
    keys = jax.random.split(key, 24)

    def normal(k, shape, scale=0.1):
        return (scale * jax.random.normal(k, shape)).astype(jnp.float32)

    def xavier(k, shape):  # nn.init.xavier_normal_ on [out, in]
        std = (2.0 / (shape[0] + shape[1])) ** 0.5
        return (std * jax.random.normal(k, shape)).astype(jnp.float32)

    def gru_params(k0, k1, din):
        return {'w_ih': normal(k0, (3 * H, din)),
                'w_hh': normal(k1, (3 * H, H)),
                'b_ih': jnp.zeros((1, 3 * H), jnp.float32),
                'b_hh': jnp.zeros((1, 3 * H), jnp.float32)}

    p = {'H': H}
    # S2VTAttModel.vid2hid (xavier_normal init; unused in forward)
    p['vid2hid_w'] = xavier(keys[0], (H, H))
    p['vid2hid_b'] = jnp.zeros((1, H), jnp.float32)
    # encoder
    p['W_v2h'] = xavier(keys[1], (H, dim_vid))
    p['b_v2h'] = jnp.zeros((1, H), jnp.float32)
    p['enc_vid_gru'] = gru_params(keys[2], keys[3], H)
    p['enc_sent_gru'] = gru_params(keys[4], keys[5], H)
    p['enc_syn_gru'] = gru_params(keys[6], keys[7], H)
    p['E_word'] = normal(keys[8], (vocab, H), 0.5)
    p['E_char'] = normal(keys[9], (char_vocab, H), 0.5)
    # caption decoder  (sos_id: set to the model's actual <sos> token id)
    p['dec'] = {'E': normal(keys[10], (vocab, H), 0.5),
                'Wq': xavier(keys[11], (H, H)),
                'gru': gru_params(keys[12], keys[13], 2 * H),
                'Wout': xavier(keys[14], (vocab, H)),
                'bout': jnp.zeros((1, vocab), jnp.float32),
                'max_len': max_len,
                'sos_id': 0}
    # syntax decoder
    p['dec_syn'] = {'E': normal(keys[15], (parse_vocab, H), 0.5),
                    'Wq': xavier(keys[16], (H, H)),
                    'gru': gru_params(keys[17], keys[18], 2 * H),
                    'Wout': xavier(keys[19], (parse_vocab, H)),
                    'bout': jnp.zeros((1, parse_vocab), jnp.float32),
                    'max_len': max_len,
                    'sos_id': 0}
    return p


# ----------------------------------------------------------------------------
if __name__ == "__main__":
    # Small but lane/sublane-aligned shapes: B multiple of 8, H / vocab
    # multiples of 128 so gate slices, MXU tiles and output stores are dense.
    B, T_vid, dim_vid, H = 8, 8, 128, 128
    vocab, char_vocab, parse_vocab = 256, 64, 128
    L_sent, L_char, L_parse = 8, 6, 6

    root = jax.random.PRNGKey(0)
    kp, k1, k2, k3, k4, k5, k6, k7, k8 = jax.random.split(root, 9)

    params = init_params(kp, dim_vid, H, vocab, char_vocab, parse_vocab,
                         max_len=L_sent)

    vid_feats = jax.random.normal(k1, (B, T_vid, dim_vid), jnp.float32)
    target_variable = jax.random.randint(k2, (B, L_sent), 0, vocab)
    target_variable_template = jax.random.randint(k3, (B, L_sent), 0, vocab)
    labels_character = jax.random.randint(k4, (B, L_char), 0, char_vocab)
    labels_random_character = jax.random.randint(k5, (B, L_char), 0, char_vocab)
    labels_character_template = jax.random.randint(k6, (B, L_char), 0,
                                                   char_vocab)
    target_variable_parse = jax.random.randint(k7, (B, L_parse), 0, parse_vocab)
    target_variable_parse_template = jax.random.randint(k8, (B, L_parse), 0,
                                                        parse_vocab)

    outs = s2vt_att_forward(
        params, vid_feats, target_variable, target_variable_template,
        labels_character, labels_random_character, labels_character_template,
        target_variable_parse, target_variable_parse_template,
        mode='train', opt={})
    outs = jax.block_until_ready(outs)

    (seq_prob, seq_prob_sen, seq_prob_sen_t, seq_prob_syn, seq_prob_syn1,
     seq_prob_syn_t, seq_prob_syn_t1) = outs
    assert seq_prob.shape == (B, L_sent - 1, vocab)
    assert seq_prob_sen.shape == (B, L_sent - 1, vocab)
    assert seq_prob_sen_t.shape == (B, L_sent - 1, vocab)
    assert seq_prob_syn.shape == (B, L_parse - 1, parse_vocab)
    assert seq_prob_syn1.shape == (B, L_parse - 1, parse_vocab)
    assert seq_prob_syn_t.shape == (B, L_parse - 1, parse_vocab)
    assert seq_prob_syn_t1.shape == (B, L_parse - 1, parse_vocab)
    assert all(bool(jnp.all(jnp.isfinite(o))) for o in outs)

    print("KERNEL_OK")
</pallas_src>

<mosaic_0001>
module attributes {stable_mosaic.version = 11 : i64} {
  func.func @_linear_kernel(%arg0: memref<64x128xbf16, #tpu.memory_space<vmem>>, %arg1: memref<128x128xbf16, #tpu.memory_space<vmem>>, %arg2: memref<1x128xf32, #tpu.memory_space<vmem>>, %arg3: memref<64x128xf32, #tpu.memory_space<vmem>>) attributes {dimension_semantics = [], scalar_prefetch = 0 : i64, scratch_operands = 0 : i64, tpu.core_type = #tpu.core_type<tc>} {
    %c0 = arith.constant 0 : index
    %c0_0 = arith.constant 0 : index
    %0 = vector.load %arg0[%c0, %c0_0] : memref<64x128xbf16, #tpu.memory_space<vmem>>, vector<64x128xbf16>
    %c0_1 = arith.constant 0 : index
    %c0_2 = arith.constant 0 : index
    %1 = vector.load %arg1[%c0_1, %c0_2] : memref<128x128xbf16, #tpu.memory_space<vmem>>, vector<128x128xbf16>
    %cst = arith.constant dense<0.000000e+00> : vector<64x128xf32>
    %2 = tpu.matmul %0, %1, %cst {dimension_numbers = #tpu.dot_dimension_numbers<[1], [1], [0], [0], [0, 0, 1, 0], [], []>} : vector<64x128xbf16>, vector<128x128xbf16>, vector<64x128xf32> -> vector<64x128xf32>
    %c0_3 = arith.constant 0 : index
    %c0_4 = arith.constant 0 : index
    %3 = vector.load %arg2[%c0_3, %c0_4] : memref<1x128xf32, #tpu.memory_space<vmem>>, vector<1x128xf32>
    %4 = vector.broadcast %3 : vector<1x128xf32> to vector<64x128xf32>
    %5 = arith.addf %2, %4 : vector<64x128xf32>
    %c0_5 = arith.constant 0 : index
    %c0_6 = arith.constant 0 : index
    %6 = vector.load %arg3[%c0_5, %c0_6] : memref<64x128xf32, #tpu.memory_space<vmem>>, vector<64x128xf32>
    tpu.vector_store %arg3[%c0_5, %c0_6], %5 {strides = array<i32>} : memref<64x128xf32, #tpu.memory_space<vmem>>, vector<64x128xf32>,
    return
  }
}

</mosaic_0001>

<bundles_post_ra>
// kernel: tpu_custom_call.1
= control target key start
LH: loop header
LB: loop body
LE: loop exit
PB: predicated region body
PF: predicated region fallthrough
CT: control target
= control target key end

     0   :  { %8 = vsyncpa [#allocation3], 0  ;;  %s460_s0 = inlined_call_operand.hbm [shape: bf16[64,128], index: 0, kind: input, shape index: {}]   ;;  %s461_s1 = inlined_call_operand.hbm [shape: bf16[128,128], index: 1, kind: input, shape index: {}]   ;;  %s462_s2 = inlined_call_operand.vmem [shape: f32[1,128], index: 2, kind: input, shape index: {}]   ;;  %s463_s3 = inlined_call_operand.hbm [shape: f32[64,128], index: 3, kind: output, shape index: {}]  }
   0x1   :  { %9 = vsyncpa [#allocation6], 0 }
   0x2   :  { %10 = vsyncpa [#allocation4], 0  ;;  %s394_s12 = smov [#allocation2]   ;;  %s322_s16 = scalar_lea.hbm %s460_s0, 512 }
   0x3   :  { %s16_s13 = sshll.u32 %s394_s12, 4  ;;  %p323_p0 = scmp.ne.s32.totalorder %s460_s0, %s322_s16  ;;  %s17_s13 = int_to_ptr.vmem [resolvable:$true] %s16_s13 }
   0x4   :  { %p326_p1 = scmp.lt.u32.totalorder %s322_s16, %s460_s0 }
   0x6   :  { %p328_p2 = pnand %p326_p1, %p323_p0 }
   0x8   :  { %331 = shalt.err (!%p328_p2)
}
   0x9   :  { %s332_s21 = scalar_lea.vmem %s17_s13, 512  ;;  %p337_p4 = scmp.lt.s32.totalorder %s17_s13, %s17_s13 }
   0xa   :  { %p333_p3 = scmp.ne.s32.totalorder %s17_s13, %s332_s21  ;;  %p338_p5 = scmp.lt.s32.totalorder %s332_s21, %s332_s21 }
   0xc   :  { %p339_p6 = por %p338_p5, %p337_p4 }
   0xe   :  { %p340_p7 = pnand %p339_p6, %p333_p3 }
  0x10   :  { %343 = shalt.err (!%p340_p7)
}
  0x11   :  { %s395_s22 = smov 64   ;;  %s396_s23 = smov 4  }
  0x12   :  { %22 = dma.hbm_to_vmem [thread:$0]  %s460_s0, 512, %s17_s13, [#allocation3], %s395_s22, %s395_s22, %s396_s23  }
  0x13   :  { %s397_s26 = smov [#allocation5]   ;;  %s344_s30 = scalar_lea.hbm %s461_s1, 1024 }
  0x14   :  { %s28_s27 = sshll.u32 %s397_s26, 4  ;;  %p345_p8 = scmp.ne.s32.totalorder %s461_s1, %s344_s30  ;;  %s29_s27 = int_to_ptr.vmem [resolvable:$true] %s28_s27 }
  0x15   :  { %p348_p9 = scmp.lt.u32.totalorder %s344_s30, %s461_s1 }
  0x17   :  { %p350_p10 = pnand %p348_p9, %p345_p8 }
  0x19   :  { %353 = shalt.err (!%p350_p10)
}
  0x1a   :  { %s354_s8 = scalar_lea.vmem %s29_s27, 1024  ;;  %p359_p12 = scmp.lt.s32.totalorder %s29_s27, %s29_s27 }
  0x1b   :  { %p355_p11 = scmp.ne.s32.totalorder %s29_s27, %s354_s8  ;;  %p360_p13 = scmp.lt.s32.totalorder %s354_s8, %s354_s8 }
  0x1d   :  { %p361_p0 = por %p360_p13, %p359_p12 }
  0x1f   :  { %p362_p1 = pnand %p361_p0, %p355_p11 }
  0x21   :  { %365 = shalt.err (!%p362_p1)
}
  0x22   :  { %34 = dma.hbm_to_vmem [thread:$0]  %s461_s1, 1024, %s29_s27, [#allocation6], %s395_s22, %s395_s22, %s396_s23  }
  0x23   :  { %388 = dma.done.wait [#allocation3], 512  }
  0x24   :  { %389 = vsyncadd [#allocation3], 4294966784 }
  0x25   :  { %390 = dma.done.wait [#allocation6], 1024  }
  0x26   :  { %391 = vsyncadd [#allocation6], 4294966272  ;;  %v310_v0 = vld [vmem:[#allocation5] sm:$0xff]   ;;  %v311_v1 = vld [vmem:[#allocation5 + $0x8] sm:$0xff]   ;;  %s398_s11 = smov [#allocation7]  }
  0x27   :  { %263 = vmatprep.subr.bf16.mxu0 %v310_v0  ;;  %287 = vmatprep.subr.bf16.mxu1 %v310_v0  ;;  %v312_v2 = vld [vmem:[#allocation5 + $0x10] sm:$0xff]   ;;  %v318_v3 = vld [vmem:[#allocation2] sm:$0xff]   ;;  %v313_v5 = vld [vmem:[#allocation5 + $0x18] sm:$0xff]   ;;  %s225_s12 = sshll.u32 %s398_s11, 4  ;;  %s226_s12 = int_to_ptr.vmem [resolvable:$true] %s225_s12 }
  0x28   :  { %264 = vmatpush3.bf16.xpose.msra.mxu0 %v310_v0  ;;  %295 = vmatpush3.bf16.xpose.msra.mxu1 %v310_v0  ;;  %v319_v4 = vld [vmem:[#allocation2 + $0x10] sm:$0xff]   ;;  %v314_v6 = vld [vmem:[#allocation5 + $0x20] sm:$0xff]   ;;  %v315_v7 = vld [vmem:[#allocation5 + $0x28] sm:$0xff]   ;;  %p371_p3 = scmp.lt.s32.totalorder %s226_s12, %s226_s12 }
  0x29   :  { %265 = vmatprep.subr.bf16.mxu0 %v311_v1  ;;  %288 = vmatprep.subr.bf16.mxu1 %v311_v1  ;;  %v316_v8 = vld [vmem:[#allocation5 + $0x30] sm:$0xff]   ;;  %v317_v9 = vld [vmem:[#allocation5 + $0x38] sm:$0xff]   ;;  %v320_v10 = vld [vmem:[#allocation2 + $0x8] sm:$0xff]  }
  0x2a   :  { %279 = vmatprep.mubr.bf16.mxu0 %v318_v3  ;;  %283 = vmatprep.mubr.bf16.mxu1 %v319_v4  ;;  %v321_v11 = vld [vmem:[#allocation2 + $0x18] sm:$0xff]   ;;  %v238_v12 = vld [vmem:[%s462_s2] ss:$0 sm:$0xff]  ;;  %s366_s2 = scalar_lea.vmem %s226_s12, 1024 }
  0x2b   :  { %p367_p2 = scmp.ne.s32.totalorder %s226_s12, %s366_s2  ;;  %p372_p4 = scmp.lt.s32.totalorder %s366_s2, %s366_s2 }
  0x2d   :  { %p373_p5 = por %p372_p4, %p371_p3 }
  0x2f   :  { %p374_p6 = pnand %p373_p5, %p367_p2 }
  0x30   :  { %266 = vmatpush3.bf16.xpose.msra.mxu0 %v311_v1  ;;  %296 = vmatpush3.bf16.xpose.msra.mxu1 %v311_v1 }
  0x31   :  { %267 = vmatprep.subr.bf16.mxu0 %v312_v2  ;;  %289 = vmatprep.subr.bf16.mxu1 %v312_v2 }
  0x38   :  { %268 = vmatpush3.bf16.xpose.msra.mxu0 %v312_v2  ;;  %297 = vmatpush3.bf16.xpose.msra.mxu1 %v312_v2 }
  0x39   :  { %269 = vmatprep.subr.bf16.mxu0 %v313_v5  ;;  %290 = vmatprep.subr.bf16.mxu1 %v313_v5 }
  0x40   :  { %270 = vmatpush3.bf16.xpose.msra.mxu0 %v313_v5  ;;  %298 = vmatpush3.bf16.xpose.msra.mxu1 %v313_v5 }
  0x41   :  { %271 = vmatprep.subr.bf16.mxu0 %v314_v6  ;;  %291 = vmatprep.subr.bf16.mxu1 %v314_v6 }
  0x48   :  { %272 = vmatpush3.bf16.xpose.msra.mxu0 %v314_v6  ;;  %299 = vmatpush3.bf16.xpose.msra.mxu1 %v314_v6 }
  0x49   :  { %273 = vmatprep.subr.bf16.mxu0 %v315_v7  ;;  %292 = vmatprep.subr.bf16.mxu1 %v315_v7 }
  0x50   :  { %274 = vmatpush3.bf16.xpose.msra.mxu0 %v315_v7  ;;  %300 = vmatpush3.bf16.xpose.msra.mxu1 %v315_v7 }
  0x51   :  { %275 = vmatprep.subr.bf16.mxu0 %v316_v8  ;;  %293 = vmatprep.subr.bf16.mxu1 %v316_v8 }
  0x58   :  { %276 = vmatpush3.bf16.xpose.msra.mxu0 %v316_v8  ;;  %301 = vmatpush3.bf16.xpose.msra.mxu1 %v316_v8 }
  0x59   :  { %277 = vmatprep.subr.bf16.mxu0 %v317_v9  ;;  %294 = vmatprep.subr.bf16.mxu1 %v317_v9 }
  0x60   :  { %278 = vmatpush3.bf16.xpose.msra.mxu0 %v317_v9  ;;  %302 = vmatpush3.bf16.xpose.msra.mxu1 %v317_v9 }
  0x67   :  { %280 = vmatmul.mubr.bf16.vlgmr.msra.gmra.mrb[0].mxu0 %v320_v10  ;;  %284 = vmatmul.mubr.bf16.vlgmr.msra.gmra.mrb[0].mxu1 %v321_v11 }
 0x13a   :  { %v281_v13 = vpop.f32.mrb[0].mxu0  ;;  %v285_v14 = vpop.f32.mrb[0].mxu1 }
 0x13b   :  { %v190_v15 = vadd.f32 %v281_v13, %v238_v12  ;;  %v206_v16 = vadd.f32 %v285_v14, %v238_v12  ;;  %v181_v17 = vpop.f32.mrb[1].mxu0  ;;  %v197_v18 = vpop.f32.mrb[1].mxu1 }
 0x13c   :  { %v182_v19 = vadd.f32 %v238_v12, %v181_v17  ;;  %v198_v20 = vadd.f32 %v238_v12, %v197_v18  ;;  %v282_v21 = vpop.f32.mrb[2].mxu0  ;;  %v286_v22 = vpop.f32.mrb[2].mxu1 }
 0x13d   :  { %214 = vst [vmem:[#allocation7 + $0x10] sm:$0xff] %v190_v15  ;;  %218 = vst [vmem:[#allocation7 + $0x30] sm:$0xff] %v206_v16  ;;  %v193_v23 = vadd.f32 %v282_v21, %v238_v12  ;;  %v209_v24 = vadd.f32 %v286_v22, %v238_v12  ;;  %v184_v25 = vpop.f32.mrb[3].mxu0  ;;  %v200_v26 = vpop.f32.mrb[3].mxu1 }
 0x13e   :  { %212 = vst [vmem:[#allocation7] sm:$0xff] %v182_v19  ;;  %216 = vst [vmem:[#allocation7 + $0x20] sm:$0xff] %v198_v20  ;;  %v185_v27 = vadd.f32 %v238_v12, %v184_v25  ;;  %v201_v28 = vadd.f32 %v238_v12, %v200_v26 }
 0x13f   :  { %215 = vst [vmem:[#allocation7 + $0x18] sm:$0xff] %v193_v23  ;;  %219 = vst [vmem:[#allocation7 + $0x38] sm:$0xff] %v209_v24 }
 0x140   :  { %213 = vst [vmem:[#allocation7 + $0x8] sm:$0xff] %v185_v27  ;;  %217 = vst [vmem:[#allocation7 + $0x28] sm:$0xff] %v201_v28 }
 0x141   :  { %377 = shalt.err (!%p374_p6)
}
 0x142   :  { %s378_s15 = scalar_lea.hbm %s463_s3, 1024 }
 0x143   :  { %p379_p7 = scmp.ne.s32.totalorder %s463_s3, %s378_s15  ;;  %p382_p8 = scmp.lt.u32.totalorder %s378_s15, %s463_s3 }
 0x145   :  { %p384_p9 = pnand %p382_p8, %p379_p7 }
 0x147   :  { %387 = shalt.err (!%p384_p9)
}
 0x148   :  { %s399_s20 = smov 128   ;;  %s400_s21 = smov 8  }
 0x149   :  { %231 = dma.vmem_to_hbm [thread:$0]  %s226_s12, 1024, %s463_s3, [#allocation4], %s399_s20, %s399_s20, %s400_s21  }
 0x14a   :  { %392 = dma.done.wait [#allocation4], 1024  }
 0x14b   :  { %393 = vsyncadd [#allocation4], 4294966272 }
 0x14c   :  { %235 = vsyncpa [#allocation3], 1 }
 0x14d   :  { %236 = vsyncpa [#allocation6], 1 }
 0x14e   :  { %237 = vsyncpa [#allocation4], 1 }

</bundles_post_ra>
